<compile_context>
chip_gen: v6e
topology: v6e:2x2x1
jax: 0.10.0
libtpu: 0.0.40
codegen_flags: <defaults>
</compile_context>

<pallas_src>
import functools

import jax
import jax.numpy as jnp
from jax.experimental import pallas as pl
from jax.experimental.pallas import tpu as pltpu


# --------------------------------------------------------------------------- #
# Kernel A: projection preamble (z = h @ W, fused attention projections)
# --------------------------------------------------------------------------- #
def project_kernel(h_ref, w_ref, acat_ref, z_ref, edst_ref, esrc_ref):
    # z = h @ W   (MXU, f32 accumulation; inputs already in compute dtype).
    z = jnp.dot(h_ref[...], w_ref[...], preferred_element_type=jnp.float32)

    # Both attention projections fused into a single lane-dense matmul:
    # acat[:, 0] = a_dst, acat[:, 1] = a_src, remaining columns are zero.
    e2 = jnp.dot(z.astype(acat_ref.dtype), acat_ref[...],
                 preferred_element_type=jnp.float32)          # (TR, 128) f32
    edst_ref[...] = e2[:, 0:1]                                # (TR, 1) sublane-major
    # Slice first, then transpose only one column (review: ~128x less XLU work).
    esrc_ref[...] = jnp.transpose(e2[:, 1:2])                 # (1, TR) lane-major

    # Store z; reserve the last (zero-padded) feature column as a constant 1 so
    # the softmax denominator is accumulated by the attention MXU matmul.
    z_ref[...] = z.astype(z_ref.dtype)
    fp = z_ref.shape[1]
    z_ref[:, fp - 1:fp] = jnp.ones((z.shape[0], 1), z_ref.dtype)


# --------------------------------------------------------------------------- #
# Kernel B: tiled masked softmax + aggregation (flash-style online softmax)
# --------------------------------------------------------------------------- #
def attention_kernel(edst_ref, esrc_ref, adj_ref, z_ref, out_ref,
                     m_ref, acc_ref, *,
                     col_tile, rows_per_word, negative_slope,
                     exp_dtype, approx_recip):
    j = pl.program_id(1)

    @pl.when(j == 0)
    def _():
        m_ref[...] = jnp.full_like(m_ref, -jnp.inf)
        acc_ref[...] = jnp.zeros_like(acc_ref)

    row_tile = m_ref.shape[0]

    # scores[i, c] = LeakyReLU(e_dst[i] + e_src[c])   (edge c -> i), kept in f32.
    scores = edst_ref[...] + esrc_ref[...]                    # (TR, TC) f32
    scores = jnp.maximum(scores, negative_slope * scores)     # LeakyReLU (0<slope<1)

    # Edge mask.  Bit-packed adjacency: word p, bit b  <->  local dest row b*TRW+p.
    if rows_per_word > 1:
        trw = row_tile // rows_per_word
        words = jnp.concatenate([adj_ref[...]] * rows_per_word, axis=0)  # (TR,TC) i32
        bit = jax.lax.broadcasted_iota(jnp.int32, (row_tile, col_tile), 0) // trw
        edge = ((words >> bit) & 1) != 0
    else:
        edge = adj_ref[...] != 0
    # Self-loops guarantee every real row has an unmasked entry, so exp underflow
    # to exact zero is sufficient — no second masking pass needed.
    scores = jnp.where(edge, scores, -1e30)

    # Online softmax update (running max in f32; denominator rides in the last
    # column of the f32 accumulator via the reserved ones-column of z).
    m_prev = m_ref[...]
    m_new = jnp.maximum(m_prev, jnp.max(scores, axis=-1, keepdims=True))
    corr = jnp.exp(m_prev - m_new)
    # Subtract in f32, then cast; exp in compute dtype (bf16 on v6e/v7x fast path).
    p = jnp.exp((scores - m_new).astype(exp_dtype))           # masked -> exactly 0

    col0 = pl.multiple_of(j * col_tile, col_tile)
    z_blk = z_ref[pl.ds(col0, col_tile), :]                   # resident z, sliced
    acc_ref[...] = corr * acc_ref[...] + jnp.dot(
        p.astype(z_ref.dtype), z_blk, preferred_element_type=jnp.float32)
    m_ref[...] = m_new

    @pl.when(j == pl.num_programs(1) - 1)
    def _():
        fp = acc_ref.shape[1]
        denom = acc_ref[:, fp - 1:fp]                         # softmax denominator
        inv = pl.reciprocal(denom, approx=approx_recip)       # EUP slot when approx
        out_ref[...] = (acc_ref[...] * inv).astype(out_ref.dtype)


# --------------------------------------------------------------------------- #
# Wrapper
# --------------------------------------------------------------------------- #
def _round_up(x, m):
    return ((x + m - 1) // m) * m


def _pick_tile(requested, n_pad, gran):
    """Largest multiple of `gran` that divides n_pad and is <= requested."""
    best = gran
    t = gran
    while t <= min(requested, n_pad):
        if n_pad % t == 0:
            best = t
        t += gran
    return best


def gat_forward(h, w, a_src, a_dst, adj, *, negative_slope=0.2,
                compute_dtype=jnp.bfloat16, exp_dtype=None,
                approx_reciprocal=True, row_tile=512, col_tile=512,
                pack_adjacency=True):
    """GAT forward.  h:(N,F_in)  w:(F_in,F_out)  a_*:(F_out,1)  adj:(N,N)."""
    N, f_in = h.shape
    f_out = w.shape[1]
    out_dtype = h.dtype
    cdt = jnp.dtype(compute_dtype)
    exp_dt = cdt if exp_dtype is None else jnp.dtype(exp_dtype)

    # Lane-dense feature padding, plus one reserved denominator column.
    f_pad = max(128, _round_up(f_out + 1, 128))

    # Row tiles: multiples of 256 when bit-packing (32 packed rows x 8 sublanes);
    # column tiles: multiples of 128.  Both always divide n_pad exactly, and
    # n_pad never exceeds round_up(N, base) (avoids wasted padded row tiles).
    base = 256 if pack_adjacency else 128
    n_pad = _round_up(N, base)
    row_tile = _pick_tile(max(row_tile, base), n_pad, base)
    col_tile = _pick_tile(max(col_tile, 128), n_pad, 128)
    n_row_tiles = n_pad // row_tile
    n_col_tiles = n_pad // col_tile

    # Pad / cast inputs (zero-padded rows & feature columns are exact no-ops).
    hp = jnp.zeros((n_pad, f_in), cdt).at[:N, :].set(h.astype(cdt))
    wp = jnp.zeros((f_in, f_pad), cdt).at[:, :f_out].set(w.astype(cdt))
    # NOTE: on the bf16 fast path the attention weights carry bf16 error on top
    # of bf16 z; fine for the stated tolerance.
    acat = jnp.zeros((f_pad, 128), jnp.float32)
    acat = acat.at[:f_out, 0].set(a_dst[:, 0]).at[:f_out, 1].set(a_src[:, 0])
    acat = acat.astype(cdt)

    adj_bool = jnp.zeros((n_pad, n_pad), jnp.bool_).at[:N, :N].set(adj != 0)
    if pack_adjacency:
        rows_per_word = 32
        trw = row_tile // 32
        # word p of row-tile i, bit b  <->  global dest row i*row_tile + b*trw + p
        a4 = adj_bool.reshape(n_row_tiles, 32, trw, n_pad)
        weights = (jnp.uint32(1) << jnp.arange(32, dtype=jnp.uint32)
                   ).reshape(1, 32, 1, 1)
        packed = jnp.sum(a4.astype(jnp.uint32) * weights, axis=1,
                         dtype=jnp.uint32)
        adj_in = jax.lax.bitcast_convert_type(packed, jnp.int32
                                              ).reshape(n_pad // 32, n_pad)
        adj_block = (trw, col_tile)
        adj_index = lambda i, j: (i, j)
    else:
        rows_per_word = 1
        adj_in = adj_bool.astype(jnp.int8)
        adj_block = (row_tile, col_tile)
        adj_index = lambda i, j: (i, j)

    # ---- Kernel A: projection preamble ------------------------------------ #
    cost_a = pl.CostEstimate(
        flops=2 * n_pad * f_in * f_pad + 2 * n_pad * f_pad * 128,
        transcendentals=0,
        bytes_accessed=(n_pad * f_in + f_in * f_pad + f_pad * 128
                        + n_pad * f_pad) * cdt.itemsize + 2 * n_pad * 4)
    z, e_dst, e_src = pl.pallas_call(
        project_kernel,
        out_shape=(
            jax.ShapeDtypeStruct((n_pad, f_pad), cdt),         # z (+ ones column)
            jax.ShapeDtypeStruct((n_pad, 1), jnp.float32),     # e_dst (sublane-major)
            jax.ShapeDtypeStruct((1, n_pad), jnp.float32),     # e_src (lane-major)
        ),
        grid=(n_row_tiles,),
        in_specs=[
            pl.BlockSpec((row_tile, f_in), lambda i: (i, 0)),
            pl.BlockSpec((f_in, f_pad), lambda i: (0, 0)),
            pl.BlockSpec((f_pad, 128), lambda i: (0, 0)),
        ],
        out_specs=(
            pl.BlockSpec((row_tile, f_pad), lambda i: (i, 0)),
            pl.BlockSpec((row_tile, 1), lambda i: (i, 0)),
            pl.BlockSpec((1, row_tile), lambda i: (0, i)),
        ),
        compiler_params=pltpu.CompilerParams(
            dimension_semantics=("parallel",),
            vmem_limit_bytes=32 * 1024 * 1024),
        cost_estimate=cost_a,
    )(hp, wp, acat)

    # ---- Kernel B: tiled attention ----------------------------------------- #
    # VMEM budget: resident z (x2 buffers) + adj tile (x2) + f32 acc + out (x2)
    # + small e/m vectors.  Capped at 48 MiB so it is safe on v7x (64 MiB phys).
    adj_tile_bytes = adj_block[0] * adj_block[1] * adj_in.dtype.itemsize
    vmem_need = (2 * n_pad * f_pad * cdt.itemsize
                 + 2 * adj_tile_bytes
                 + row_tile * f_pad * 4
                 + 2 * row_tile * f_pad * jnp.dtype(out_dtype).itemsize
                 + 6 * row_tile * 128 * 4)
    vmem_b = int(min(48 * 1024 * 1024, max(32 * 1024 * 1024, 2 * vmem_need)))

    cost_b = pl.CostEstimate(
        flops=2 * n_pad * n_pad * f_pad + 12 * n_pad * n_pad,
        transcendentals=n_pad * n_pad,
        bytes_accessed=(adj_in.size * adj_in.dtype.itemsize          # packed adj
                        + n_pad * f_pad * cdt.itemsize               # z (once)
                        + n_pad * f_pad * jnp.dtype(out_dtype).itemsize
                        + n_pad * 8))                                # e_dst + e_src
    kernel_b = functools.partial(
        attention_kernel, col_tile=col_tile, rows_per_word=rows_per_word,
        negative_slope=negative_slope, exp_dtype=exp_dt,
        approx_recip=approx_reciprocal)
    out_p = pl.pallas_call(
        kernel_b,
        out_shape=jax.ShapeDtypeStruct((n_pad, f_pad), out_dtype),
        grid=(n_row_tiles, n_col_tiles),
        in_specs=[
            pl.BlockSpec((row_tile, 1), lambda i, j: (i, 0)),         # e_dst
            pl.BlockSpec((1, col_tile), lambda i, j: (0, j)),         # e_src
            pl.BlockSpec(adj_block, adj_index),                       # adj (packed)
            # z is VMEM-resident: constant block index => DMA'd once, never
            # re-streamed per (i, j) tile (review item #1).
            pl.BlockSpec((n_pad, f_pad), lambda i, j: (0, 0)),
        ],
        out_specs=pl.BlockSpec((row_tile, f_pad), lambda i, j: (i, 0)),
        scratch_shapes=[
            pltpu.VMEM((row_tile, 1), jnp.float32),      # running max
            pltpu.VMEM((row_tile, f_pad), jnp.float32),  # f32 accumulator (+denom col)
        ],
        compiler_params=pltpu.CompilerParams(
            # Row axis "parallel" so v7x's 2 TensorCores shard row tiles.
            dimension_semantics=("parallel", "arbitrary"),
            vmem_limit_bytes=vmem_b),
        cost_estimate=cost_b,
    )(e_dst, e_src, adj_in, z)

    return out_p[:N, :f_out]


def gat_reference(h, w, a_src, a_dst, adj, *, negative_slope=0.2):
    """Pure-JAX reference (dense equivalent of the DGL message passing)."""
    z = h @ w
    e_src = z @ a_src                     # (N, 1)
    e_dst = z @ a_dst                     # (N, 1)
    scores = e_dst + e_src.T
    scores = jnp.where(scores >= 0.0, scores, negative_slope * scores)
    scores = jnp.where(adj > 0.0, scores, -jnp.inf)
    alpha = jax.nn.softmax(scores, axis=-1)
    return alpha @ z


if __name__ == "__main__":
    # Small Cora-like shapes; large enough to exercise multiple row/column tiles
    # (n_pad = 768 -> 3 row tiles x 2 column tiles with the clamped defaults).
    N, F_IN, F_OUT = 600, 32, 16

    key = jax.random.PRNGKey(0)
    k_h, k_w, k_as, k_ad, k_adj = jax.random.split(key, 5)

    # Node features.
    h = jax.random.normal(k_h, (N, F_IN), dtype=jnp.float32)

    # Parameters (shapes match the module):
    #   fc.weight: (F_OUT, F_IN)            -> stored transposed as w: (F_IN, F_OUT)
    #   attention_func.weight: (1, 2*F_OUT) -> split into a_src, a_dst: (F_OUT, 1)
    w = 0.1 * jax.random.normal(k_w, (F_IN, F_OUT), dtype=jnp.float32)
    a_src = 0.1 * jax.random.normal(k_as, (F_OUT, 1), dtype=jnp.float32)
    a_dst = 0.1 * jax.random.normal(k_ad, (F_OUT, 1), dtype=jnp.float32)

    # Synthetic graph: random edges + self-loops (adj[i, j] != 0  <=>  edge j -> i).
    adj = (jax.random.uniform(k_adj, (N, N)) < 0.2).astype(jnp.float32)
    adj = jnp.maximum(adj, jnp.eye(N, dtype=jnp.float32))
    assert bool(jnp.all(jnp.diag(adj) > 0))   # every softmax row is non-empty

    ref = gat_reference(h, w, a_src, a_dst, adj, negative_slope=0.2)

    # Fast path: bf16 MXU + bf16 exp, bit-packed adjacency, resident z,
    # EUP approximate reciprocal.
    out_fast = jax.block_until_ready(
        gat_forward(h, w, a_src, a_dst, adj, negative_slope=0.2))
    assert out_fast.shape == (N, F_OUT)
    assert jnp.allclose(out_fast, ref, atol=2e-2, rtol=2e-2), "bf16 path mismatch"

    # Precise path: f32 matmuls, f32 exp, exact reciprocal, tight tolerance.
    out_f32 = jax.block_until_ready(
        gat_forward(h, w, a_src, a_dst, adj, negative_slope=0.2,
                    compute_dtype=jnp.float32, exp_dtype=jnp.float32,
                    approx_reciprocal=False))
    assert out_f32.shape == (N, F_OUT)
    assert jnp.allclose(out_f32, ref, atol=1e-4, rtol=1e-4), "f32 path mismatch"

    print("KERNEL_OK")
</pallas_src>

<mosaic_0001>
module attributes {stable_mosaic.version = 11 : i64} {
  func.func @project_kernel(%arg0: i32, %arg1: memref<256x32xbf16, #tpu.memory_space<vmem>>, %arg2: memref<32x128xbf16, #tpu.memory_space<vmem>>, %arg3: memref<128x128xbf16, #tpu.memory_space<vmem>>, %arg4: memref<256x128xbf16, #tpu.memory_space<vmem>>, %arg5: memref<256x1xf32, #tpu.memory_space<vmem>>, %arg6: memref<1x256xf32, #tpu.memory_space<vmem>>) attributes {dimension_semantics = [#tpu.dimension_semantics<parallel>], iteration_bounds = array<i64: 3>, scalar_prefetch = 0 : i64, scratch_operands = 0 : i64, tpu.core_type = #tpu.core_type<tc>, window_params = [{transform_indices = @transform_0, window_bounds = array<i64: 256, 32>}, {pipeline_mode = #tpu.pipeline_mode<synchronous>, transform_indices = @transform_1, window_bounds = array<i64: 32, 128>}, {pipeline_mode = #tpu.pipeline_mode<synchronous>, transform_indices = @transform_2, window_bounds = array<i64: 128, 128>}, {transform_indices = @transform_3, window_bounds = array<i64: 256, 128>}, {transform_indices = @transform_4, window_bounds = array<i64: 256, 1>}, {transform_indices = @transform_5, window_bounds = array<i64: 1, 256>}]} {
    %c0 = arith.constant 0 : index
    %c0_0 = arith.constant 0 : index
    %0 = vector.load %arg1[%c0, %c0_0] : memref<256x32xbf16, #tpu.memory_space<vmem>>, vector<256x32xbf16>
    %c0_1 = arith.constant 0 : index
    %c0_2 = arith.constant 0 : index
    %1 = vector.load %arg2[%c0_1, %c0_2] : memref<32x128xbf16, #tpu.memory_space<vmem>>, vector<32x128xbf16>
    %cst = arith.constant dense<0.000000e+00> : vector<256x128xf32>
    %2 = tpu.matmul %0, %1, %cst {dimension_numbers = #tpu.dot_dimension_numbers<[1], [0], [0], [1], [0, 0, 1, 1], [], []>} : vector<256x32xbf16>, vector<32x128xbf16>, vector<256x128xf32> -> vector<256x128xf32>
    %3 = arith.truncf %2 : vector<256x128xf32> to vector<256x128xbf16>
    %c0_3 = arith.constant 0 : index
    %c0_4 = arith.constant 0 : index
    %4 = vector.load %arg3[%c0_3, %c0_4] : memref<128x128xbf16, #tpu.memory_space<vmem>>, vector<128x128xbf16>
    %cst_5 = arith.constant dense<0.000000e+00> : vector<256x128xf32>
    %5 = tpu.matmul %3, %4, %cst_5 {dimension_numbers = #tpu.dot_dimension_numbers<[1], [0], [0], [1], [0, 0, 1, 1], [], []>} : vector<256x128xbf16>, vector<128x128xbf16>, vector<256x128xf32> -> vector<256x128xf32>
    %6 = vector.extract_strided_slice %5 {offsets = [0, 0], sizes = [256, 1], strides = [1, 1]} : vector<256x128xf32> to vector<256x1xf32>
    %c0_6 = arith.constant 0 : index
    %c0_7 = arith.constant 0 : index
    %7 = vector.load %arg5[%c0_6, %c0_7] : memref<256x1xf32, #tpu.memory_space<vmem>>, vector<256x1xf32>
    tpu.vector_store %arg5[%c0_6, %c0_7], %6 {strides = array<i32>} : memref<256x1xf32, #tpu.memory_space<vmem>>, vector<256x1xf32>,
    %8 = vector.extract_strided_slice %5 {offsets = [0, 1], sizes = [256, 1], strides = [1, 1]} : vector<256x128xf32> to vector<256x1xf32>
    %9 = tpu.transpose %8, [1, 0] : vector<256x1xf32> -> vector<1x256xf32>
    %c0_8 = arith.constant 0 : index
    %c0_9 = arith.constant 0 : index
    %10 = vector.load %arg6[%c0_8, %c0_9] : memref<1x256xf32, #tpu.memory_space<vmem>>, vector<1x256xf32>
    tpu.vector_store %arg6[%c0_8, %c0_9], %9 {strides = array<i32>} : memref<1x256xf32, #tpu.memory_space<vmem>>, vector<1x256xf32>,
    %11 = arith.truncf %2 : vector<256x128xf32> to vector<256x128xbf16>
    %c0_10 = arith.constant 0 : index
    %c0_11 = arith.constant 0 : index
    %12 = vector.load %arg4[%c0_10, %c0_11] : memref<256x128xbf16, #tpu.memory_space<vmem>>, vector<256x128xbf16>
    tpu.vector_store %arg4[%c0_10, %c0_11], %11 {strides = array<i32>} : memref<256x128xbf16, #tpu.memory_space<vmem>>, vector<256x128xbf16>,
    %cst_12 = arith.constant 1.000000e+00 : bf16
    %13 = vector.broadcast %cst_12 : bf16 to vector<256x1xbf16>
    %c0_13 = arith.constant 0 : index
    %c127 = arith.constant 127 : index
    %14 = vector.load %arg4[%c0_13, %c127] : memref<256x128xbf16, #tpu.memory_space<vmem>>, vector<256x1xbf16>
    tpu.vector_store %arg4[%c0_13, %c127], %13 {strides = array<i32>} : memref<256x128xbf16, #tpu.memory_space<vmem>>, vector<256x1xbf16>,
    return
  }
  func.func @transform_0(%arg0: i32) -> (i32, i32) {
    %c0_i32 = arith.constant 0 : i32
    %c0_i32_0 = arith.constant 0 : i32
    return %arg0, %c0_i32 : i32, i32
  }
  func.func @transform_1(%arg0: i32) -> (i32, i32) {
    %c0_i32 = arith.constant 0 : i32
    %c0_i32_0 = arith.constant 0 : i32
    %c0_i32_1 = arith.constant 0 : i32
    return %c0_i32, %c0_i32_0 : i32, i32
  }
  func.func @transform_2(%arg0: i32) -> (i32, i32) {
    %c0_i32 = arith.constant 0 : i32
    %c0_i32_0 = arith.constant 0 : i32
    %c0_i32_1 = arith.constant 0 : i32
    return %c0_i32, %c0_i32_0 : i32, i32
  }
  func.func @transform_3(%arg0: i32) -> (i32, i32) {
    %c0_i32 = arith.constant 0 : i32
    %c0_i32_0 = arith.constant 0 : i32
    return %arg0, %c0_i32 : i32, i32
  }
  func.func @transform_4(%arg0: i32) -> (i32, i32) {
    %c0_i32 = arith.constant 0 : i32
    %c0_i32_0 = arith.constant 0 : i32
    return %arg0, %c0_i32 : i32, i32
  }
  func.func @transform_5(%arg0: i32) -> (i32, i32) {
    %c0_i32 = arith.constant 0 : i32
    %c0_i32_0 = arith.constant 0 : i32
    return %c0_i32, %arg0 : i32, i32
  }
}

</mosaic_0001>

<bundles_post_ra>
// kernel: tpu_custom_call.1
= control target key start
LH: loop header
LB: loop body
LE: loop exit
PB: predicated region body
PF: predicated region fallthrough
CT: control target
= control target key end

     0   :  { %11 = vsyncpa [#allocation3], 0  ;;  %s2395_s0 = inlined_call_operand.vmem [shape: bf16[768,32], index: 0, kind: input, shape index: {}]   ;;  %s2396_s1 = inlined_call_operand.vmem [shape: bf16[32,128], index: 1, kind: input, shape index: {}]   ;;  %s2397_s2 = inlined_call_operand.vmem [shape: bf16[128,128], index: 2, kind: input, shape index: {}]   ;;  %s2398_s3 = inlined_call_operand.hbm [shape: bf16[768,128], index: 3, kind: output, shape index: {0}]   ;;  %s2399_s4 = inlined_call_operand.vmem [shape: f32[768,1], index: 4, kind: output, shape index: {1}]   ;;  %s2400_s5 = inlined_call_operand.hbm [shape: f32[1,768], index: 5, kind: output, shape index: {2}]  }
   0x1   :  { %13 = vsyncpa [#allocation3 + $0x1], 0 }
   0x2   :  { %14 = vsyncpa [#allocation5], 0 }
   0x3   :  { %16 = vsyncpa [#allocation5 + $0x1], 0  ;;  %s1985_s18 = smov 0   ;;  %s1987_s19 = smov 0  }
   0x4   :  { %s1989_s20 = smov 0   ;;  %s1991_s21 = smov 0  }
   0x5 LB: > { %s2006_s22 = sadd.s32 4294967295, %s1946_s21   ;;  %s1418_s23 = sadd.s32 4294967294, %s1946_s21   ;;  %s1946_s21 = sphi %s1991_s21, %s2406_s21   ;;  %s1942_s20 = sphi %s1989_s20, %s2405_s20   ;;  %s1938_s19 = sphi %s1987_s19, %s2404_s19   ;;  %s1934_s18 = sphi %s1985_s18, %s2403_s18  }
   0x6   : > { %s2010_s24 = sadd.s32 1, %s1946_s21   ;;  %s97_s25 = sadd.s32 1, %s1942_s20 }
   0x7   : > { %s94_s26 = ssub.s32 %s1946_s21, %s2010_s24  ;;  %p107_p0 = scmp.ne.s32.totalorder %s1942_s20, %s1938_s19 }
   0x8   : > { %p95_p1 = scmp.eq.s32.totalorder %s94_s26, 0  ;;  %p108_p2 = scmp.eq.s32.totalorder %s2006_s22, 2 }
   0x9   : > { %p113_p3 = scmp.ne.s32.totalorder %s1938_s19, %s1934_s18  ;;  %p114_p4 = scmp.eq.s32.totalorder %s1418_s23, 2 }
   0xa   : > { %s2021_s27 = scalar_select %p95_p1, %s1942_s20, %s97_s25  }
   0xb   : > { %p2023_p5 = por %p108_p2, %p107_p0  ;;  %p2027_p6 = por %p114_p4, %p113_p3 }
   0xc   : > { %p1421_p7 = scmp.ge.s32.totalorder %s1946_s21, 1  ;;  %p199_p8 = scmp.lt.s32.totalorder %s1946_s21, 4 }
   0xe   : > { %p200_p9 = pnand %p1421_p7, %p199_p8 }
   0xf   : > { %s2037_s7 = sshll.u32 (!%p200_p9), %s2006_s22, 5  ;;  %s2109_s17 = sand.u32 (!%p200_p9), 1, %s1938_s19  }
  0x10   : > { %203 = sbr.rel (%p200_p9) target bundleno = 746 (0x2ea), region = 32  ;;  %p238_p10 = scmp.lt.s32.totalorder (!%p200_p9), %s2037_s7, 95 }
  0x11   : > { %s1422_s25 = sshll.u32 (!%p200_p9), %s2109_s17, 7  ;;  %s1949_s9 = smov (!%p200_p9), 127  }
  0x15   : > { %v1830_v0 = vld [vmem:[%s2396_s1 + $0x8] sm:$0xff]   ;;  %v1831_v1 = vld [vmem:[%s2396_s1] sm:$0xff]   ;;  %v1848_v2 = vld [vmem:[%s2397_s2 + $0x38] sm:$0xff]   ;;  %s2047_s12 = scalar_select %p238_p10, %s2037_s7, 95  ;;  %vm381_vm0 = vcmask 261120   ;;  %vm1224_vm1 = vcmask 1044472  }
  0x16   : > { %1681 = vmatprep.subr.bf16.mxu0 %v1830_v0  ;;  %v1849_v3 = vld [vmem:[%s2397_s2 + $0x30] sm:$0xff]   ;;  %1765 = vmatprep.subr.bf16.mxu1 %v1848_v2  ;;  %v1850_v4 = vld [vmem:[%s2397_s2 + $0x28] sm:$0xff]   ;;  %v1851_v8 = vld [vmem:[%s2397_s2 + $0x20] sm:$0xff]   ;;  %v1948_v32 = vmov 1065369472   ;;  %vm832_vm2 = vcmask 7168  }
  0x17   : > { %1682 = vmatpush3.bf16.msra.mxu0 %v1830_v0  ;;  %s1425_s15 = sshll.u32 %s2047_s12, 2  ;;  %1773 = vmatpush3.bf16.msra.mxu1 %v1848_v2  ;;  %v1852_v11 = vld [vmem:[%s2397_s2 + $0x18] sm:$0xff]   ;;  %v1853_v14 = vld [vmem:[%s2397_s2 + $0x10] sm:$0xff]   ;;  %v1854_v15 = vld [vmem:[%s2397_s2 + $0x8] sm:$0xff]   ;;  %s1427_s26 = sshll.u32 %s2047_s12, 3 }
  0x18   : > { %1683 = vmatprep.subr.bf16.mxu0 %v1831_v1  ;;  %s2056_s23 = scalar_lea.vmem %s2395_s0, %s1425_s15  ;;  %1766 = vmatprep.subr.bf16.mxu1 %v1849_v3  ;;  %v1855_v25 = vld [vmem:[%s2397_s2] sm:$0xff]   ;;  %s2230_s8 = scalar_lea.vmem %s2399_s4, %s1427_s26 }
  0x19   : > { %v1832_v5 = vld [vmem:[%s2056_s23] sm:$0xff]   ;;  %v1833_v6 = vld [vmem:[%s2056_s23 + $0x8] sm:$0xff]   ;;  %v1834_v7 = vld [vmem:[%s2056_s23 + $0x10] sm:$0xff]   ;;  %s1542_s12 = sshll.u32 %s2006_s22, 11  ;;  %s1258_s15 = scalar_lea.sflag [#allocation3], %s2109_s17 }
  0x1a   : > { %1685 = vmatprep.mubr.msk.bf16.mxu0 %vm381_vm0, %v1832_v5  ;;  %v1835_v9 = vld [vmem:[%s2056_s23 + $0x18] sm:$0xff]   ;;  %v1836_v10 = vld [vmem:[%s2056_s23 + $0x20] sm:$0xff]   ;;  %v1837_v12 = vld [vmem:[%s2056_s23 + $0x28] sm:$0xff]   ;;  %s2332_s13 = scalar_lea.hbm %s2398_s3, %s1542_s12  ;;  %s1950_s22 = smov [#allocation2]  }
  0x1b   : > { %1684 = vmatpush3.bf16.msra.mxu0 %v1831_v1  ;;  %1774 = vmatpush3.bf16.msra.mxu1 %v1849_v3  ;;  %v1838_v13 = vld [vmem:[%s2056_s23 + $0x30] sm:$0xff]   ;;  %v1839_v16 = vld [vmem:[%s2056_s23 + $0x38] sm:$0xff]   ;;  %v1840_v17 = vld [vmem:[%s2056_s23 + $0x40] sm:$0xff]  }
  0x1c   : > { %1717 = vmatprep.subr.bf16.mxu0 %v1848_v2  ;;  %1767 = vmatprep.subr.bf16.mxu1 %v1850_v4  ;;  %v1841_v18 = vld [vmem:[%s2056_s23 + $0x48] sm:$0xff]   ;;  %v1842_v19 = vld [vmem:[%s2056_s23 + $0x50] sm:$0xff]   ;;  %v1843_v20 = vld [vmem:[%s2056_s23 + $0x58] sm:$0xff]  }
  0x1d   : > { %v1844_v21 = vld [vmem:[%s2056_s23 + $0x60] sm:$0xff]   ;;  %v1845_v22 = vld [vmem:[%s2056_s23 + $0x68] sm:$0xff]   ;;  %v1846_v23 = vld [vmem:[%s2056_s23 + $0x70] sm:$0xff]  }
  0x1e   : > { %1686 = vmatmul.mubr.msk.bf16.vlgmr.msra.gmra.mxu0 %vm381_vm0, %v1833_v6  ;;  %v1847_v24 = vld [vmem:[%s2056_s23 + $0x78] sm:$0xff]   ;;  %s2112_s23 = scalar_lea.vmem [#allocation2], %s1422_s25  ;;  %s1860_s25 = sshll.u32 %s1950_s22, 4  ;;  %s1861_s25 = int_to_ptr.vmem [resolvable:$false] %s1860_s25 }
  0x1f   : > { %1689 = vmatprep.mubr.msk.bf16.mxu0 %vm381_vm0, %v1834_v7  ;;  %1718 = vmatpush3.bf16.msra.mxu0 %v1848_v2  ;;  %s1281_s14 = sshll.u32 %s2112_s23, 4  ;;  %s1862_s26 = scalar_lea.vmem %s1861_s25, 4096  ;;  %s2335_s14 = int_to_ptr.vmem [resolvable:$true] %s1281_s14 }
  0x20   : > { %1719 = vmatprep.subr.bf16.mxu0 %v1849_v3  ;;  %1775 = vmatpush3.bf16.msra.mxu1 %v1850_v4  ;;  %s1856_s16 = scalar_lea.vmem %s2335_s14, 2048  ;;  %p1863_p0 = scmp.lt.s32.totalorder %s2335_s14, %s1861_s25 }
  0x21   : > { %1768 = vmatprep.subr.bf16.mxu1 %v1851_v8  ;;  %p1857_p11 = scmp.ne.s32.totalorder %s2335_s14, %s1856_s16  ;;  %p1864_p1 = scmp.lt.s32.totalorder %s1862_s26, %s1856_s16 }
  0x23   : > { %1720 = vmatpush3.bf16.msra.mxu0 %v1849_v3  ;;  %p1858_p12 = pnand %p1857_p11, %p2023_p5  ;;  %p1865_p2 = por %p1864_p1, %p1863_p0 }
  0x24   : > { %1721 = vmatprep.subr.bf16.mxu0 %v1850_v4  ;;  %1776 = vmatpush3.bf16.msra.mxu1 %v1851_v8 }
  0x25   : > { %1769 = vmatprep.subr.bf16.mxu1 %v1852_v11  ;;  %p1859_p13 = pneg %p1858_p12 }
  0x26   : > { %1690 = vmatmul.mubr.msk.bf16.gmra.mxu0 %vm381_vm0, %v1835_v9 }
  0x27   : > { %1693 = vmatprep.mubr.msk.bf16.mxu0 %vm381_vm0, %v1836_v10  ;;  %1722 = vmatpush3.bf16.msra.mxu0 %v1850_v4  ;;  %p1866_p3 = pnand %p1865_p2, %p1859_p13 }
  0x28   : > { %1723 = vmatprep.subr.bf16.mxu0 %v1851_v8  ;;  %1777 = vmatpush3.bf16.msra.mxu1 %v1852_v11 }
  0x29   : > { %1770 = vmatprep.subr.bf16.mxu1 %v1853_v14 }
  0x2b   : > { %1724 = vmatpush3.bf16.msra.mxu0 %v1851_v8 }
  0x2c   : > { %1725 = vmatprep.subr.bf16.mxu0 %v1852_v11  ;;  %1778 = vmatpush3.bf16.msra.mxu1 %v1853_v14 }
  0x2d   : > { %1771 = vmatprep.subr.bf16.mxu1 %v1854_v15 }
  0x2e   : > { %1694 = vmatmul.mubr.msk.bf16.gmra.mxu0 %vm381_vm0, %v1837_v12 }
  0x2f   : > { %1697 = vmatprep.mubr.msk.bf16.mxu0 %vm381_vm0, %v1838_v13  ;;  %1726 = vmatpush3.bf16.msra.mxu0 %v1852_v11 }
  0x30   : > { %1727 = vmatprep.subr.bf16.mxu0 %v1853_v14  ;;  %1779 = vmatpush3.bf16.msra.mxu1 %v1854_v15 }
  0x31   : > { %1772 = vmatprep.subr.bf16.mxu1 %v1855_v25 }
  0x33   : > { %1728 = vmatpush3.bf16.msra.mxu0 %v1853_v14 }
  0x34   : > { %1729 = vmatprep.subr.bf16.mxu0 %v1854_v15  ;;  %1780 = vmatpush3.bf16.msra.mxu1 %v1855_v25 }
  0x36   : > { %1698 = vmatmul.mubr.msk.bf16.gmra.mxu0 %vm381_vm0, %v1839_v16 }
  0x37   : > { %1701 = vmatprep.mubr.msk.bf16.mxu0 %vm381_vm0, %v1840_v17  ;;  %1730 = vmatpush3.bf16.msra.mxu0 %v1854_v15 }
  0x38   : > { %1731 = vmatprep.subr.bf16.mxu0 %v1855_v25 }
  0x3b   : > { %1732 = vmatpush3.bf16.msra.mxu0 %v1855_v25 }
  0x3e   : > { %1702 = vmatmul.mubr.msk.bf16.gmra.mxu0 %vm381_vm0, %v1841_v18 }
  0x3f   : > { %1705 = vmatprep.mubr.msk.bf16.mxu0 %vm381_vm0, %v1842_v19 }
  0x46   : > { %1706 = vmatmul.mubr.msk.bf16.gmra.mxu0 %vm381_vm0, %v1843_v20 }
  0x47   : > { %1709 = vmatprep.mubr.msk.bf16.mxu0 %vm381_vm0, %v1844_v21 }
  0x4e   : > { %1710 = vmatmul.mubr.msk.bf16.gmra.mxu0 %vm381_vm0, %v1845_v22 }
  0x4f   : > { %1713 = vmatprep.mubr.msk.bf16.mxu0 %vm381_vm0, %v1846_v23 }
  0x56   : > { %1714 = vmatmul.mubr.msk.bf16.gmra.mxu0 %vm381_vm0, %v1847_v24 }
  0xde   : > { %v1687_v26 = vpop.f32.mrf.mxu0 }
  0xe0   : > { %v464_v27 = vpop.f32.mrf.mxu0 }
  0xe2   : > { %v1688_v28 = vpop.f32.mrf.mxu0 }
  0xe3   : > { %v592_v29 = vpack.c.bf16 %v1688_v28, %v1687_v26 }
  0xe4   : > { %v467_v30 = vpop.f32.mrf.mxu0 }
  0xe5   : > { %1624 = vst [vmem:[%s2112_s23 + $0x8] sm:$0xff] %v592_v29   ;;  %v591_v31 = vpack.c.bf16 %v467_v30, %v464_v27 }
  0xe6   : > { %1227 = vst.msk [vmem:[%s2112_s23 + $0x8] sm:$0xf] %vm1224_vm1, %v1948_v32  ;;  %1228 = vst.msk [vmem:[%s2112_s23 + $0xc] sm:$0xf] %vm1224_vm1, %v1948_v32  ;;  %v1691_v33 = vpop.f32.mrf.mxu0 }
  0xe7   : > { %1548 = vst [vmem:[%s2112_s23] sm:$0xff] %v591_v31   ;;  %1733 = vmatprep.mubr.bf16.mxu0 %v591_v31 }
  0xe8   : > { %1225 = vst.msk [vmem:[%s2112_s23] sm:$0xf] %vm1224_vm1, %v1948_v32  ;;  %1226 = vst.msk [vmem:[%s2112_s23 + $0x4] sm:$0xf] %vm1224_vm1, %v1948_v32  ;;  %v480_v34 = vpop.f32.mrf.mxu0  ;;  %1734 = vmatmul.mubr.bf16.vlgmr.msra.gmra.mxu0 %v592_v29 }
  0xea   : > { %v1692_v35 = vpop.f32.mrf.mxu0 }
  0xeb   : > { %v594_v36 = vpack.c.bf16 %v1692_v35, %v1691_v33 }
  0xec   : > { %v483_v37 = vpop.f32.mrf.mxu0 }
  0xed   : > { %1626 = vst [vmem:[%s2112_s23 + $0x18] sm:$0xff] %v594_v36   ;;  %v593_v38 = vpack.c.bf16 %v483_v37, %v480_v34 }
  0xee   : > { %1231 = vst.msk [vmem:[%s2112_s23 + $0x18] sm:$0xf] %vm1224_vm1, %v1948_v32  ;;  %1232 = vst.msk [vmem:[%s2112_s23 + $0x1c] sm:$0xf] %vm1224_vm1, %v1948_v32  ;;  %v1695_v39 = vpop.f32.mrf.mxu0 }
  0xef   : > { %1625 = vst [vmem:[%s2112_s23 + $0x10] sm:$0xff] %v593_v38   ;;  %1737 = vmatprep.mubr.bf16.mxu1 %v593_v38 }
  0xf0   : > { %1229 = vst.msk [vmem:[%s2112_s23 + $0x10] sm:$0xf] %vm1224_vm1, %v1948_v32  ;;  %1230 = vst.msk [vmem:[%s2112_s23 + $0x14] sm:$0xf] %vm1224_vm1, %v1948_v32  ;;  %v496_v40 = vpop.f32.mrf.mxu0  ;;  %1738 = vmatmul.mubr.bf16.vlgmr.msra.gmra.mxu1 %v594_v36 }
  0xf2   : > { %v1696_v41 = vpop.f32.mrf.mxu0 }
  0xf3   : > { %v596_v42 = vpack.c.bf16 %v1696_v41, %v1695_v39 }
  0xf4   : > { %v499_v43 = vpop.f32.mrf.mxu0 }
  0xf5   : > { %1628 = vst [vmem:[%s2112_s23 + $0x28] sm:$0xff] %v596_v42   ;;  %v595_v44 = vpack.c.bf16 %v499_v43, %v496_v40 }
  0xf6   : > { %1235 = vst.msk [vmem:[%s2112_s23 + $0x28] sm:$0xf] %vm1224_vm1, %v1948_v32  ;;  %1236 = vst.msk [vmem:[%s2112_s23 + $0x2c] sm:$0xf] %vm1224_vm1, %v1948_v32  ;;  %v1699_v45 = vpop.f32.mrf.mxu0 }
  0xf7   : > { %1627 = vst [vmem:[%s2112_s23 + $0x20] sm:$0xff] %v595_v44   ;;  %1741 = vmatprep.mubr.bf16.mxu1 %v595_v44 }
  0xf8   : > { %1233 = vst.msk [vmem:[%s2112_s23 + $0x20] sm:$0xf] %vm1224_vm1, %v1948_v32  ;;  %1234 = vst.msk [vmem:[%s2112_s23 + $0x24] sm:$0xf] %vm1224_vm1, %v1948_v32  ;;  %1742 = vmatmul.mubr.bf16.gmra.mxu1 %v596_v42  ;;  %v512_v46 = vpop.f32.mrf.mxu0 }
  0xfa   : > { %v1700_v47 = vpop.f32.mrf.mxu0 }
  0xfb   : > { %v598_v48 = vpack.c.bf16 %v1700_v47, %v1699_v45 }
  0xfc   : > { %v515_v49 = vpop.f32.mrf.mxu0 }
  0xfd   : > { %1630 = vst [vmem:[%s2112_s23 + $0x38] sm:$0xff] %v598_v48   ;;  %v597_v50 = vpack.c.bf16 %v515_v49, %v512_v46 }
  0xfe   : > { %1239 = vst.msk [vmem:[%s2112_s23 + $0x38] sm:$0xf] %vm1224_vm1, %v1948_v32  ;;  %1240 = vst.msk [vmem:[%s2112_s23 + $0x3c] sm:$0xf] %vm1224_vm1, %v1948_v32  ;;  %v1703_v51 = vpop.f32.mrf.mxu0 }
  0xff   : > { %1629 = vst [vmem:[%s2112_s23 + $0x30] sm:$0xff] %v597_v50   ;;  %1745 = vmatprep.mubr.bf16.mxu1 %v597_v50 }
 0x100   : > { %1237 = vst.msk [vmem:[%s2112_s23 + $0x30] sm:$0xf] %vm1224_vm1, %v1948_v32  ;;  %1238 = vst.msk [vmem:[%s2112_s23 + $0x34] sm:$0xf] %vm1224_vm1, %v1948_v32  ;;  %1746 = vmatmul.mubr.bf16.gmra.mxu1 %v598_v48  ;;  %v528_v52 = vpop.f32.mrf.mxu0 }
 0x102   : > { %v1704_v53 = vpop.f32.mrf.mxu0 }
 0x103   : > { %v600_v54 = vpack.c.bf16 %v1704_v53, %v1703_v51 }
 0x104   : > { %v531_v55 = vpop.f32.mrf.mxu0 }
 0x105   : > { %1632 = vst [vmem:[%s2112_s23 + $0x48] sm:$0xff] %v600_v54   ;;  %v599_v56 = vpack.c.bf16 %v531_v55, %v528_v52 }
 0x106   : > { %1243 = vst.msk [vmem:[%s2112_s23 + $0x48] sm:$0xf] %vm1224_vm1, %v1948_v32  ;;  %1244 = vst.msk [vmem:[%s2112_s23 + $0x4c] sm:$0xf] %vm1224_vm1, %v1948_v32  ;;  %v1707_v57 = vpop.f32.mrf.mxu0 }
 0x107   : > { %1631 = vst [vmem:[%s2112_s23 + $0x40] sm:$0xff] %v599_v56   ;;  %1749 = vmatprep.mubr.bf16.mxu1 %v599_v56 }
 0x108   : > { %1241 = vst.msk [vmem:[%s2112_s23 + $0x40] sm:$0xf] %vm1224_vm1, %v1948_v32  ;;  %1242 = vst.msk [vmem:[%s2112_s23 + $0x44] sm:$0xf] %vm1224_vm1, %v1948_v32  ;;  %1750 = vmatmul.mubr.bf16.gmra.mxu1 %v600_v54  ;;  %v544_v58 = vpop.f32.mrf.mxu0 }
 0x10a   : > { %v1708_v59 = vpop.f32.mrf.mxu0 }
 0x10b   : > { %v602_v60 = vpack.c.bf16 %v1708_v59, %v1707_v57 }
 0x10c   : > { %v547_v61 = vpop.f32.mrf.mxu0 }
 0x10d   : > { %1634 = vst [vmem:[%s2112_s23 + $0x58] sm:$0xff] %v602_v60   ;;  %v601_v62 = vpack.c.bf16 %v547_v61, %v544_v58 }
 0x10e   : > { %1247 = vst.msk [vmem:[%s2112_s23 + $0x58] sm:$0xf] %vm1224_vm1, %v1948_v32  ;;  %1248 = vst.msk [vmem:[%s2112_s23 + $0x5c] sm:$0xf] %vm1224_vm1, %v1948_v32  ;;  %v1711_v63 = vpop.f32.mrf.mxu0 }
 0x10f   : > { %1633 = vst [vmem:[%s2112_s23 + $0x50] sm:$0xff] %v601_v62   ;;  %1753 = vmatprep.mubr.bf16.mxu1 %v601_v62 }
 0x110   : > { %1245 = vst.msk [vmem:[%s2112_s23 + $0x50] sm:$0xf] %vm1224_vm1, %v1948_v32  ;;  %1246 = vst.msk [vmem:[%s2112_s23 + $0x54] sm:$0xf] %vm1224_vm1, %v1948_v32  ;;  %1754 = vmatmul.mubr.bf16.gmra.mxu1 %v602_v60  ;;  %v560_v0 = vpop.f32.mrf.mxu0 }
 0x112   : > { %v1712_v1 = vpop.f32.mrf.mxu0 }
 0x113   : > { %v604_v2 = vpack.c.bf16 %v1712_v1, %v1711_v63 }
 0x114   : > { %v563_v3 = vpop.f32.mrf.mxu0 }
 0x115   : > { %1636 = vst [vmem:[%s2112_s23 + $0x68] sm:$0xff] %v604_v2   ;;  %v603_v4 = vpack.c.bf16 %v563_v3, %v560_v0 }
 0x116   : > { %1251 = vst.msk [vmem:[%s2112_s23 + $0x68] sm:$0xf] %vm1224_vm1, %v1948_v32  ;;  %1252 = vst.msk [vmem:[%s2112_s23 + $0x6c] sm:$0xf] %vm1224_vm1, %v1948_v32  ;;  %v1715_v5 = vpop.f32.mrf.mxu0 }
 0x117   : > { %1635 = vst [vmem:[%s2112_s23 + $0x60] sm:$0xff] %v603_v4   ;;  %1757 = vmatprep.mubr.bf16.mxu1 %v603_v4 }
 0x118   : > { %1249 = vst.msk [vmem:[%s2112_s23 + $0x60] sm:$0xf] %vm1224_vm1, %v1948_v32  ;;  %1250 = vst.msk [vmem:[%s2112_s23 + $0x64] sm:$0xf] %vm1224_vm1, %v1948_v32  ;;  %1758 = vmatmul.mubr.bf16.gmra.mxu1 %v604_v2  ;;  %v576_v6 = vpop.f32.mrf.mxu0 }
 0x11a   : > { %v1716_v7 = vpop.f32.mrf.mxu0 }
 0x11b   : > { %v606_v8 = vpack.c.bf16 %v1716_v7, %v1715_v5 }
 0x11c   : > { %v579_v9 = vpop.f32.mrf.mxu0 }
 0x11d   : > { %1638 = vst [vmem:[%s2112_s23 + $0x78] sm:$0xff] %v606_v8   ;;  %v605_v10 = vpack.c.bf16 %v579_v9, %v576_v6 }
 0x11e   : > { %1255 = vst.msk [vmem:[%s2112_s23 + $0x78] sm:$0xf] %vm1224_vm1, %v1948_v32  ;;  %1256 = vst.msk [vmem:[%s2112_s23 + $0x7c] sm:$0xf] %vm1224_vm1, %v1948_v32 }
 0x11f   : > { %1637 = vst [vmem:[%s2112_s23 + $0x70] sm:$0xff] %v605_v10   ;;  %1761 = vmatprep.mubr.bf16.mxu1 %v605_v10 }
 0x120   : > { %1253 = vst.msk [vmem:[%s2112_s23 + $0x70] sm:$0xf] %vm1224_vm1, %v1948_v32  ;;  %1254 = vst.msk [vmem:[%s2112_s23 + $0x74] sm:$0xf] %vm1224_vm1, %v1948_v32  ;;  %1762 = vmatmul.mubr.bf16.gmra.mxu1 %v606_v8 }
 0x1a8   : > { %v1735_v11 = vpop.f32.mrf.mxu0 }
 0x1a9   : > { %835 = vst.msk [vmem:[%s2230_s8 + $0x10] sm:$0xff] %vm832_vm2, %v1735_v11  ;;  %901 = vrot.lane.b32.xlu1 %v1735_v11, %s1949_s9 }
 0x1aa   : > { %v705_v12 = vpop.f32.mrf.mxu0 }
 0x1ab   : > { %833 = vst.msk [vmem:[%s2230_s8] sm:$0xff] %vm832_vm2, %v705_v12  ;;  %897 = vrot.lane.b32.xlu0 %v705_v12, %s1949_s9 }
 0x1ac   : > { %v1736_v13 = vpop.f32.mrf.mxu0 }
 0x1ad   : > { %836 = vst.msk [vmem:[%s2230_s8 + $0x18] sm:$0xff] %vm832_vm2, %v1736_v13  ;;  %903 = vrot.lane.b32.xlu1 %v1736_v13, %s1949_s9 }
 0x1ae   : > { %v708_v14 = vpop.f32.mrf.mxu0 }
 0x1af   : > { %834 = vst.msk [vmem:[%s2230_s8 + $0x8] sm:$0xff] %vm832_vm2, %v708_v14  ;;  %899 = vrot.lane.b32.xlu0 %v708_v14, %s1949_s9 }
 0x1b0   : > { %v1739_v15 = vpop.f32.mrf.mxu1 }
 0x1b1   : > { %839 = vst.msk [vmem:[%s2230_s8 + $0x30] sm:$0xff] %vm832_vm2, %v1739_v15 }
 0x1b2   : > { %v721_v16 = vpop.f32.mrf.mxu1 }
 0x1b3   : > { %837 = vst.msk [vmem:[%s2230_s8 + $0x20] sm:$0xff] %vm832_vm2, %v721_v16  ;;  %909 = vrot.lane.b32.xlu0 %v1739_v15, %s1949_s9 }
 0x1b4   : > { %v1740_v17 = vpop.f32.mrf.mxu1 }
 0x1b5   : > { %840 = vst.msk [vmem:[%s2230_s8 + $0x38] sm:$0xff] %vm832_vm2, %v1740_v17 }
 0x1b6   : > { %v724_v18 = vpop.f32.mrf.mxu1 }
 0x1b7   : > { %838 = vst.msk [vmem:[%s2230_s8 + $0x28] sm:$0xff] %vm832_vm2, %v724_v18  ;;  %907 = vrot.lane.b32.xlu1 %v724_v18, %s1949_s9  ;;  %905 = vrot.lane.b32.xlu0 %v721_v16, %s1949_s9 }
 0x1b8   : > { %v1743_v19 = vpop.f32.mrf.mxu1 }
 0x1b9   : > { %843 = vst.msk [vmem:[%s2230_s8 + $0x50] sm:$0xff] %vm832_vm2, %v1743_v19 }
 0x1ba   : > { %v737_v20 = vpop.f32.mrf.mxu1 }
 0x1bb   : > { %841 = vst.msk [vmem:[%s2230_s8 + $0x40] sm:$0xff] %vm832_vm2, %v737_v20  ;;  %911 = vrot.lane.b32.xlu0 %v1740_v17, %s1949_s9 }
 0x1bc   : > { %v1744_v21 = vpop.f32.mrf.mxu1 }
 0x1bd   : > { %844 = vst.msk [vmem:[%s2230_s8 + $0x58] sm:$0xff] %vm832_vm2, %v1744_v21 }
 0x1be   : > { %v740_v22 = vpop.f32.mrf.mxu1 }
 0x1bf   : > { %842 = vst.msk [vmem:[%s2230_s8 + $0x48] sm:$0xff] %vm832_vm2, %v740_v22  ;;  %917 = vrot.lane.b32.xlu0 %v1743_v19, %s1949_s9 }
 0x1c0   : > { %v1747_v23 = vpop.f32.mrf.mxu1 }
 0x1c1   : > { %847 = vst.msk [vmem:[%s2230_s8 + $0x70] sm:$0xff] %vm832_vm2, %v1747_v23 }
 0x1c2   : > { %v753_v24 = vpop.f32.mrf.mxu1 }
 0x1c3   : > { %845 = vst.msk [vmem:[%s2230_s8 + $0x60] sm:$0xff] %vm832_vm2, %v753_v24  ;;  %913 = vrot.lane.b32.xlu0 %v737_v20, %s1949_s9 }
 0x1c4   : > { %v1748_v25 = vpop.f32.mrf.mxu1 }
 0x1c5   : > { %848 = vst.msk [vmem:[%s2230_s8 + $0x78] sm:$0xff] %vm832_vm2, %v1748_v25 }
 0x1c6   : > { %v756_v26 = vpop.f32.mrf.mxu1 }
 0x1c7   : > { %846 = vst.msk [vmem:[%s2230_s8 + $0x68] sm:$0xff] %vm832_vm2, %v756_v26  ;;  %919 = vrot.lane.b32.xlu0 %v1744_v21, %s1949_s9 }
 0x1c8   : > { %v1751_v27 = vpop.f32.mrf.mxu1 }
 0x1c9   : > { %851 = vst.msk [vmem:[%s2230_s8 + $0x90] sm:$0xff] %vm832_vm2, %v1751_v27  ;;  %933 = vrot.lane.b32.xlu1 %v1751_v27, %s1949_s9 }
 0x1ca   : > { %v769_v28 = vpop.f32.mrf.mxu1 }
 0x1cb   : > { %915 = vrot.lane.b32.xlu0 %v740_v22, %s1949_s9  ;;  %849 = vst.msk [vmem:[%s2230_s8 + $0x80] sm:$0xff] %vm832_vm2, %v769_v28 }
 0x1cc   : > { %v1752_v29 = vpop.f32.mrf.mxu1 }
 0x1cd   : > { %852 = vst.msk [vmem:[%s2230_s8 + $0x98] sm:$0xff] %vm832_vm2, %v1752_v29  ;;  %929 = vrot.lane.b32.xlu1 %v769_v28, %s1949_s9 }
 0x1ce   : > { %v772_v30 = vpop.f32.mrf.mxu1 }
 0x1cf   : > { %925 = vrot.lane.b32.xlu0 %v1747_v23, %s1949_s9  ;;  %850 = vst.msk [vmem:[%s2230_s8 + $0x88] sm:$0xff] %vm832_vm2, %v772_v30 }
 0x1d0   : > { %v1755_v31 = vpop.f32.mrf.mxu1 }
 0x1d1   : > { %855 = vst.msk [vmem:[%s2230_s8 + $0xb0] sm:$0xff] %vm832_vm2, %v1755_v31  ;;  %941 = vrot.lane.b32.xlu1 %v1755_v31, %s1949_s9 }
 0x1d2   : > { %v785_v32 = vpop.f32.mrf.mxu1 }
 0x1d3   : > { %921 = vrot.lane.b32.xlu0 %v753_v24, %s1949_s9  ;;  %853 = vst.msk [vmem:[%s2230_s8 + $0xa0] sm:$0xff] %vm832_vm2, %v785_v32 }
 0x1d4   : > { %v1756_v33 = vpop.f32.mrf.mxu1 }
 0x1d5   : > { %937 = vrot.lane.b32.xlu1 %v785_v32, %s1949_s9  ;;  %856 = vst.msk [vmem:[%s2230_s8 + $0xb8] sm:$0xff] %vm832_vm2, %v1756_v33 }
 0x1d6   : > { %v788_v34 = vpop.f32.mrf.mxu1 }
 0x1d7   : > { %927 = vrot.lane.b32.xlu0 %v1748_v25, %s1949_s9  ;;  %854 = vst.msk [vmem:[%s2230_s8 + $0xa8] sm:$0xff] %vm832_vm2, %v788_v34 }
 0x1d8   : > { %v1759_v35 = vpop.f32.mrf.mxu1 }
 0x1d9   : > { %943 = vrot.lane.b32.xlu1 %v1756_v33, %s1949_s9  ;;  %859 = vst.msk [vmem:[%s2230_s8 + $0xd0] sm:$0xff] %vm832_vm2, %v1759_v35 }
 0x1da   : > { %v801_v36 = vpop.f32.mrf.mxu1 }
 0x1db   : > { %923 = vrot.lane.b32.xlu0 %v756_v26, %s1949_s9  ;;  %857 = vst.msk [vmem:[%s2230_s8 + $0xc0] sm:$0xff] %vm832_vm2, %v801_v36 }
 0x1dc   : > { %v1760_v37 = vpop.f32.mrf.mxu1 }
 0x1dd   : > { %949 = vrot.lane.b32.xlu1 %v1759_v35, %s1949_s9  ;;  %860 = vst.msk [vmem:[%s2230_s8 + $0xd8] sm:$0xff] %vm832_vm2, %v1760_v37 }
 0x1de   : > { %v804_v38 = vpop.f32.mrf.mxu1 }
 0x1df   : > { %935 = vrot.lane.b32.xlu0 %v1752_v29, %s1949_s9  ;;  %858 = vst.msk [vmem:[%s2230_s8 + $0xc8] sm:$0xff] %vm832_vm2, %v804_v38 }
 0x1e0   : > { %v1763_v39 = vpop.f32.mrf.mxu1 }
 0x1e1   : > { %945 = vrot.lane.b32.xlu1 %v801_v36, %s1949_s9  ;;  %863 = vst.msk [vmem:[%s2230_s8 + $0xf0] sm:$0xff] %vm832_vm2, %v1763_v39 }
 0x1e2   : > { %v817_v40 = vpop.f32.mrf.mxu1 }
 0x1e3   : > { %931 = vrot.lane.b32.xlu0 %v772_v30, %s1949_s9  ;;  %861 = vst.msk [vmem:[%s2230_s8 + $0xe0] sm:$0xff] %vm832_vm2, %v817_v40 }
 0x1e4   : > { %v1764_v41 = vpop.f32.mrf.mxu1 }
 0x1e5   : > { %951 = vrot.lane.b32.xlu1 %v1760_v37, %s1949_s9  ;;  %864 = vst.msk [vmem:[%s2230_s8 + $0xf8] sm:$0xff] %vm832_vm2, %v1764_v41 }
 0x1e6   : > { %v820_v42 = vpop.f32.mrf.mxu1 }
 0x1e7   : > { %939 = vrot.lane.b32.xlu0 %v788_v34, %s1949_s9  ;;  %862 = vst.msk [vmem:[%s2230_s8 + $0xe8] sm:$0xff] %vm832_vm2, %v820_v42 }
 0x1e9   : > { %947 = vrot.lane.b32.xlu1 %v804_v38, %s1949_s9 }
 0x1ed   : > { %957 = vrot.lane.b32.xlu1 %v1763_v39, %s1949_s9 }
 0x1f1   : > { %953 = vrot.lane.b32.xlu1 %v817_v40, %s1949_s9 }
 0x1f5   : > { %959 = vrot.lane.b32.xlu1 %v1764_v41, %s1949_s9 }
 0x1f9   : > { %955 = vrot.lane.b32.xlu1 %v820_v42, %s1949_s9 }
 0x21b   : > { %v902_v45 = vpop.permute.xlu1 %901 }
 0x21d   : > { %v898_v43 = vpop.permute.xlu0 %897 }
 0x21e   : > { %993 = vxpose.xlu0.b32.start [1/16] (narrow) %v898_v43, 8 }
 0x21f   : > { %v904_v47 = vpop.permute.xlu1 %903 }
 0x221   : > { %v900_v44 = vpop.permute.xlu0 %899 }
 0x222   : > { %994 = vxpose.xlu0.b32.cont [2/16] (narrow) %v900_v44, 8 }
 0x225   : > { %v910_v46 = vpop.permute.xlu0 %909 }
 0x226   : > { %995 = vxpose.xlu0.b32.cont [3/16] (narrow) %v902_v45, 8 }
 0x229   : > { %v906_v48 = vpop.permute.xlu0 %905  ;;  %v908_v50 = vpop.permute.xlu1 %907 }
 0x22a   : > { %996 = vxpose.xlu0.b32.cont [4/16] (narrow) %v904_v47, 8 }
 0x22d   : > { %v912_v49 = vpop.permute.xlu0 %911 }
 0x22e   : > { %997 = vxpose.xlu0.b32.cont [5/16] (narrow) %v906_v48, 8 }
 0x231   : > { %v918_v51 = vpop.permute.xlu0 %917 }
 0x232   : > { %998 = vxpose.xlu0.b32.cont [6/16] (narrow) %v908_v50, 8 }
 0x235   : > { %v914_v52 = vpop.permute.xlu0 %913 }
 0x236   : > { %999 = vxpose.xlu0.b32.cont [7/16] (narrow) %v910_v46, 8 }
 0x239   : > { %v920_v53 = vpop.permute.xlu0 %919 }
 0x23a   : > { %1000 = vxpose.xlu0.b32.cont [8/16] (narrow) %v912_v49, 8 }
 0x23b   : > { %v934_v54 = vpop.permute.xlu1 %933 }
 0x23d   : > { %v916_v55 = vpop.permute.xlu0 %915 }
 0x23e   : > { %1001 = vxpose.xlu0.b32.cont [9/16] (narrow) %v914_v52, 8 }
 0x23f   : > { %v930_v56 = vpop.permute.xlu1 %929 }
 0x240   : > { %1025 = vxpose.xlu1.b32.start [1/16] (narrow) %v930_v56, 8 }
 0x241   : > { %v926_v57 = vpop.permute.xlu0 %925 }
 0x242   : > { %1002 = vxpose.xlu0.b32.cont [10/16] (narrow) %v916_v55, 8 }
 0x243   : > { %v942_v60 = vpop.permute.xlu1 %941 }
 0x245   : > { %v922_v58 = vpop.permute.xlu0 %921 }
 0x246   : > { %1003 = vxpose.xlu0.b32.cont [11/16] (narrow) %v918_v51, 8 }
 0x247   : > { %v938_v62 = vpop.permute.xlu1 %937 }
 0x249   : > { %v928_v59 = vpop.permute.xlu0 %927 }
 0x24a   : > { %1004 = vxpose.xlu0.b32.cont [12/16] (narrow) %v920_v53, 8 }
 0x24b   : > { %v944_v0 = vpop.permute.xlu1 %943 }
 0x24d   : > { %v924_v61 = vpop.permute.xlu0 %923 }
 0x24e   : > { %1005 = vxpose.xlu0.b32.cont [13/16] (narrow) %v922_v58, 8 }
 0x251   : > { %v936_v63 = vpop.permute.xlu0 %935 }
 0x252   : > { %1006 = vxpose.xlu0.b32.cont [14/16] (narrow) %v924_v61, 8 }
 0x255   : > { %v932_v1 = vpop.permute.xlu0 %931 }
 0x256   : > { %1007 = vxpose.xlu0.b32.cont [15/16] (narrow) %v926_v57, 8  ;;  %1026 = vxpose.xlu1.b32.cont [2/16] (narrow) %v932_v1, 8 }
 0x257   : > { %1869 = shalt.err (!%p1866_p3)
}
 0x258   : > { %s1870_s23 = scalar_lea.hbm %s2332_s13, 2048  ;;  %s1874_s8 = scalar_lea.hbm %s2398_s3, 6144 }
 0x259   : > { %p1871_p4 = scmp.ne.s32.totalorder %s2332_s13, %s1870_s23  ;;  %p1875_p9 = scmp.lt.s32.totalorder %s2332_s13, %s2398_s3 }
 0x25a   : > { %p1876_p10 = scmp.lt.s32.totalorder %s1874_s8, %s1870_s23 }
 0x25b   : > { %p1872_p7 = pnand %p1871_p4, %p2023_p5 }
 0x25c   : > { %p1877_p11 = por %p1876_p10, %p1875_p9 }
 0x25d   : > { %p1873_p8 = pneg %p1872_p7 }
 0x25f   : > { %p1878_p12 = pnand %p1877_p11, %p1873_p8 }
 0x261   : > { %1881 = shalt.err (!%p1878_p12)
}
 0x262   : > { %s1951_s10 = smov 64   ;;  %s1952_s11 = smov 4   ;;  %1008 = vxpose.xlu0.b32.end [16/16] (narrow) %v928_v59, 8  ;;  %1027 = vxpose.xlu1.b32.cont [3/16] (narrow) %v934_v54, 8  ;;  %v950_v2 = vpop.permute.xlu1 %949  ;;  %v940_v4 = vpop.permute.xlu0 %939  ;;  %v1953_v11 = vmov 1966171168   ;;  %v1063_v13 = vlaneseq }
 0x263   : > { %1781 = dma.vmem_to_hbm [thread:$0]  (%p2023_p5), %s2335_s14, 2048, %s2332_s13, %s1258_s15, %s1951_s10, %s1951_s10, %s1952_s11   ;;  %v1061_v12 = vunpack.c.l.s4 %v1953_v11 }
 0x264   : > { %v1064_v15 = vshrl.u32 %v1063_v13, 7  ;;  %s1423_s13 = sshll.u32 %s2109_s17, 1  ;;  %vm1077_vm3 = vcmp.lt.s32.totalorder %v1063_v13, 256  ;;  %s1300_s25 = scalar_lea.hbm %s2400_s5, %s2037_s7 }
 0x265   : > { %v1062_v14 = vunpack.c.0.s8 %v1061_v12  ;;  %s236_s14 = scalar_lea.vmem [#allocation4], %s1423_s13  ;;  %s1268_s26 = scalar_lea.sflag [#allocation5], %s2109_s17 }
 0x266   : > { %1028 = vxpose.xlu1.b32.cont [4/16] (narrow) %v936_v63, 8  ;;  %v946_v3 = vpop.permute.xlu1 %945  ;;  %s1302_s15 = sshll.u32 %s236_s14, 4  ;;  %s1954_s30 = smov [#allocation4]   ;;  %s1303_s15 = int_to_ptr.vmem [resolvable:$true] %s1302_s15 }
 0x267   : > { %v1065_v17 = vsub.s32 %v1062_v14, %v1064_v15  ;;  %s1882_s23 = scalar_lea.vmem %s1303_s15, 32  ;;  %s1886_s6 = sshll.u32 %s1954_s30, 4  ;;  %s1887_s6 = int_to_ptr.vmem [resolvable:$false] %s1886_s6 }
 0x268   : > { %p1883_p13 = scmp.ne.s32.totalorder %s1303_s15, %s1882_s23  ;;  %s1888_s8 = scalar_lea.vmem %s1887_s6, 64 }
 0x269   : > { %p1889_p2 = scmp.lt.s32.totalorder %s1303_s15, %s1887_s6  ;;  %p1890_p3 = scmp.lt.s32.totalorder %s1888_s8, %s1882_s23 }
 0x26a   : > { %1029 = vxpose.xlu1.b32.cont [5/16] (narrow) %v938_v62, 8  ;;  %v952_v5 = vpop.permute.xlu1 %951  ;;  %p1884_p0 = pnand %p1883_p13, %p2023_p5 }
 0x26b   : > { %p1891_p4 = por %p1890_p3, %p1889_p2 }
 0x26c   : > { %p1885_p1 = pneg %p1884_p0 }
 0x26e   : > { %1030 = vxpose.xlu1.b32.cont [6/16] (narrow) %v940_v4, 8  ;;  %v948_v6 = vpop.permute.xlu1 %947  ;;  %p1892_p7 = pnand %p1891_p4, %p1885_p1 }
 0x272   : > { %1031 = vxpose.xlu1.b32.cont [7/16] (narrow) %v942_v60, 8  ;;  %v958_v7 = vpop.permute.xlu1 %957 }
 0x276   : > { %1032 = vxpose.xlu1.b32.cont [8/16] (narrow) %v944_v0, 8  ;;  %v954_v8 = vpop.permute.xlu1 %953 }
 0x27a   : > { %1033 = vxpose.xlu1.b32.cont [9/16] (narrow) %v946_v3, 8  ;;  %v960_v9 = vpop.permute.xlu1 %959 }
 0x27e   : > { %1034 = vxpose.xlu1.b32.cont [10/16] (narrow) %v948_v6, 8  ;;  %v956_v10 = vpop.permute.xlu1 %955 }
 0x282   : > { %1035 = vxpose.xlu1.b32.cont [11/16] (narrow) %v950_v2, 8 }
 0x286   : > { %1036 = vxpose.xlu1.b32.cont [12/16] (narrow) %v952_v5, 8 }
 0x28a   : > { %1037 = vxpose.xlu1.b32.cont [13/16] (narrow) %v954_v8, 8 }
 0x28e   : > { %1038 = vxpose.xlu1.b32.cont [14/16] (narrow) %v956_v10, 8 }
 0x292   : > { %1039 = vxpose.xlu1.b32.cont [15/16] (narrow) %v958_v7, 8 }
 0x296   : > { %1040 = vxpose.xlu1.b32.end [16/16] (narrow) %v960_v9, 8 }
 0x2a2   : > { %v1009_v16 = vpop.trf.xlu0 }
 0x2d6   : > { %v1041_v18 = vpop.trf.xlu1 }
 0x2d7   : > { %v1059_v19 = vcombine.low %v1009_v16, %v1041_v18 }
 0x2d9   : > { %v1066_v20 = vrot.slane %v1059_v19, %v1065_v17 }
 0x2db   : > { %v1073_v21 = vrot.slane %v1066_v20, %v1065_v17 }
 0x2dd   : > { %1079 = vst.msk [vmem:[%s236_s14] sm:$0x3] %vm1077_vm3, %v1073_v21 }
 0x2de   : > { %1895 = shalt.err (!%p1892_p7)
}
 0x2df   : > { %s1896_s9 = scalar_lea.hbm %s1300_s25, 32  ;;  %s1900_s12 = scalar_lea.hbm %s2400_s5, 96 }
 0x2e0   : > { %p1897_p8 = scmp.ne.s32.totalorder %s1300_s25, %s1896_s9  ;;  %p1901_p11 = scmp.lt.s32.totalorder %s1300_s25, %s2400_s5 }
 0x2e1   : > { %p1902_p12 = scmp.lt.s32.totalorder %s1900_s12, %s1896_s9 }
 0x2e2   : > { %p1898_p9 = pnand %p1897_p8, %p2023_p5 }
 0x2e3   : > { %p1903_p13 = por %p1902_p12, %p1901_p11 }
 0x2e4   : > { %p1899_p10 = pneg %p1898_p9 }
 0x2e6   : > { %p1904_p0 = pnand %p1903_p13, %p1899_p10 }
 0x2e8   : > { %1907 = shalt.err (!%p1904_p0)
}
 0x2e9   : > { %1782 = dma.vmem_to_hbm [thread:$0]  (%p2023_p5), %s1303_s15, 32, %s1300_s25, %s1268_s26  }
 0x2ea PF: > { %p1792_p1 = scmp.ge.s32.totalorder %s1946_s21, 2  ;;  %s1314_s13 = sand.u32 1, %s1934_s18  }
 0x2eb   : > { %s1315_s14 = scalar_lea.sflag [#allocation3], %s1314_s13 }
 0x2ec   : > { %p1786_p2 = pnand %p1792_p1, %p2027_p6 }
 0x2ee   : > { %p1787_p3 = pneg %p1786_p2 }
 0x2f0   : > { %1925 = dma.done.wait (%p1787_p3), %s1315_s14, 2048  }
 0x2f1   : > { %1927 = vsyncadd (%p1787_p3), %s1315_s14, 4294965248  ;;  %s1332_s16 = scalar_lea.sflag [#allocation5], %s1314_s13 }
 0x2f2   : > { %1929 = dma.done.wait (%p1787_p3), %s1332_s16, 32  }
 0x2f3   : > { %1931 = vsyncadd (%p1787_p3), %s1332_s16, 4294967264  ;;  %p19_p5 = scmp.ge.s32.totalorder %s2010_s24, 5   ;;  %s2403_s18 = smov %s1938_s19 }
 0x2f4   : > { %s2404_s19 = smov %s1942_s20  ;;  %s2405_s20 = smov %s2021_s27 }
 0x2f5   : > { %s2406_s21 = smov %s2010_s24  ;;  %21 = sbr.rel (!%p19_p5) target bundleno = 5 (0x5), region = 96 }
 0x2fa   :  { %1337 = vsyncpa [#allocation3], 1 }
 0x2fb   :  { %1339 = vsyncpa [#allocation3 + $0x1], 1 }
 0x2fc   :  { %1340 = vsyncpa [#allocation5], 1 }
 0x2fd   :  { %1342 = vsyncpa [#allocation5 + $0x1], 1 }

</bundles_post_ra>
